<compile_context>
chip_gen: v5e
topology: v5e:2x2
jax: 0.10.0
libtpu: 0.0.40
codegen_flags: <defaults>
</compile_context>

<pallas_src>
import math

import jax
import jax.numpy as jnp
from jax.experimental import pallas as pl
from jax.experimental.pallas import tpu as pltpu

LN_EPS = 1e-5
_INV_SQRT2 = 1.0 / math.sqrt(2.0)
_MiB = 1024 * 1024


def _round_up(x, m):
    return ((x + m - 1) // m) * m


def _vmem_limits():
    """Returns (scoped vmem limit to request, planning budget) in bytes."""
    phys = 64 * _MiB
    try:
        info = pltpu.get_tpu_info()
        phys = int(getattr(info, "vmem_capacity_bytes", phys)) or phys
    except Exception:
        pass
    phys = max(phys, 32 * _MiB)
    limit = max(min(phys - 8 * _MiB, 104 * _MiB), 24 * _MiB)   # 56 MiB on v7x, ~104 on v5e/v6e
    budget = max(limit - 12 * _MiB, 16 * _MiB)                 # headroom for compiler temps
    return limit, budget


def _pick_th(H, th_max):
    """Largest multiple-of-128 divisor of H that is <= th_max (else full H)."""
    if H % 128 != 0:
        return H
    best = 128
    t = 128
    while t <= min(th_max, H):
        if H % t == 0:
            best = t
        t += 128
    return best


def _const_spec(block_shape, index_map):
    """BlockSpec for inputs whose block index never changes.

    Requests single-buffering (saves VMEM for resident weights) when the
    installed JAX supports BlockSpec(pipeline_mode=...); otherwise falls back
    to a plain BlockSpec.
    """
    if hasattr(pl, "Buffered"):
        try:
            return pl.BlockSpec(block_shape, index_map, pipeline_mode=pl.Buffered(1))
        except TypeError:
            pass
    return pl.BlockSpec(block_shape, index_map)


def _layernorm_bf16(x_ref, g_ref, b_ref):
    # PyTorch LayerNorm: biased variance, eps=1e-5; statistics in f32.
    x = x_ref[...].astype(jnp.float32)
    mean = jnp.mean(x, axis=-1, keepdims=True)
    centered = x - mean
    var = jnp.mean(centered * centered, axis=-1, keepdims=True)
    y = centered * jax.lax.rsqrt(var + LN_EPS) * g_ref[...] + b_ref[...]
    return y.astype(jnp.bfloat16)


def _gelu_exact(h):
    # Exact erf GELU, matching PyTorch nn.GELU() default.
    return 0.5 * h * (1.0 + jax.lax.erf(h * _INV_SQRT2))


def _ffn_resident_kernel(x_ref, g_ref, b_ref, w1_ref, b1_ref, w2_ref, b2_ref, o_ref):
    """Weight-resident path: whole hidden dim per row tile."""
    y = _layernorm_bf16(x_ref, g_ref, b_ref)
    h = jnp.dot(y, w1_ref[...], preferred_element_type=jnp.float32) + b1_ref[...]
    h = _gelu_exact(h)
    # Dropout(p=0.0) is identity -> no-op.
    out = jnp.dot(h.astype(w2_ref.dtype), w2_ref[...], preferred_element_type=jnp.float32)
    o_ref[...] = (out + b2_ref[...]).astype(o_ref.dtype)


def _ffn_split_kernel(x_ref, g_ref, b_ref, w1_ref, b1_ref, w2_ref, b2_ref, o_ref, y_scr):
    """Hidden-split fallback: accumulate second matmul directly into o_ref (f32)."""
    k = pl.program_id(1)

    @pl.when(k == 0)
    def _():
        y_scr[...] = _layernorm_bf16(x_ref, g_ref, b_ref)   # LN once per row tile
        o_ref[...] = jnp.zeros_like(o_ref)

    h = jnp.dot(y_scr[...], w1_ref[...], preferred_element_type=jnp.float32) + b1_ref[...]
    h = _gelu_exact(h)
    o_ref[...] += jnp.dot(h.astype(w2_ref.dtype), w2_ref[...],
                          preferred_element_type=jnp.float32)

    @pl.when(k == pl.num_programs(1) - 1)
    def _():
        o_ref[...] += b2_ref[...]


def feed_forward(x, gamma, beta, w1, b1, w2, b2, *, tm=1024, th=512, force_split=False):
    """x: (B, N, D).  Matches nn.Sequential(LayerNorm(D), Linear(D,H), GELU(),
    Dropout(0), Linear(H,D), Dropout(0)) with bf16 MXU inputs / f32 accumulation.

    Pass bf16 `w1`/`w2` (cached at model init) to avoid a per-call cast.
    """
    B, N, D = x.shape
    H = w1.shape[1]
    rows = B * N
    x_bytes = jnp.dtype(x.dtype).itemsize

    vmem_limit, budget = _vmem_limits()

    # bf16 weights: halves weight DMA / VMEM; cast only if caller didn't already.
    w1_bf = w1 if w1.dtype == jnp.bfloat16 else w1.astype(jnp.bfloat16)
    w2_bf = w2 if w2.dtype == jnp.bfloat16 else w2.astype(jnp.bfloat16)

    # --- Row tile: large to amortize per-step overhead, but keep >=2 programs
    # on the parallel axis so both v7x TensorCores get work.
    if rows > tm:
        tm_target = _round_up(tm, 8)
    elif rows > 8:
        tm_target = _round_up((rows + 1) // 2, 8)
    else:
        tm_target = 8

    def resident_bytes(TM):
        io = 2 * TM * D * 2 * x_bytes                 # double-buffered x/out tiles
        weights = 2 * (D * H + H * D) * 2             # bf16 (conservatively 2x-buffered)
        interm = TM * H * (4 + 2)                     # f32 GELU slab + bf16 copy
        ln = TM * D * (4 + 2)
        return io + weights + interm + ln + (H + 3 * D) * 8

    def split_bytes(TM, TH):
        io = 2 * TM * D * (x_bytes + 4)
        weights = 2 * (D * TH + TH * D) * 2
        interm = TM * TH * (4 + 2)
        return io + weights + interm + TM * D * 2 + (TH + 3 * D) * 8

    TM = tm_target
    use_split = bool(force_split)
    if not use_split:
        while TM > 64 and resident_bytes(TM) > budget:
            TM = max(64, _round_up(TM // 2, 8))
        use_split = resident_bytes(TM) > budget
        if use_split:
            TM = tm_target
    if use_split:
        TH = _pick_th(H, th)
        while TM > 64 and split_bytes(TM, TH) > budget:
            TM = max(64, _round_up(TM // 2, 8))

    padded_rows = _round_up(rows, TM)
    n_row_tiles = padded_rows // TM

    x2d = x.reshape(rows, D)
    if padded_rows != rows:
        x2d = jnp.pad(x2d, ((0, padded_rows - rows), (0, 0)))

    g2 = gamma.reshape(1, D).astype(jnp.float32)
    be2 = beta.reshape(1, D).astype(jnp.float32)
    b1_2 = b1.reshape(1, H).astype(jnp.float32)
    b2_2 = b2.reshape(1, D).astype(jnp.float32)

    flops = 4 * padded_rows * D * H            # two matmuls, 2 flops/MAC
    transcendentals = padded_rows * H

    if not use_split:
        cost = pl.CostEstimate(
            flops=flops, transcendentals=transcendentals,
            bytes_accessed=(padded_rows * D * 2 * x_bytes       # x in + out
                            + (D * H + H * D) * 2               # bf16 weights, once
                            + (H + 3 * D) * 4))
        out2d = pl.pallas_call(
            _ffn_resident_kernel,
            out_shape=jax.ShapeDtypeStruct((padded_rows, D), x.dtype),
            grid_spec=pltpu.PrefetchScalarGridSpec(
                num_scalar_prefetch=0,
                grid=(n_row_tiles,),
                in_specs=[
                    pl.BlockSpec((TM, D), lambda i: (i, 0)),     # x row tile
                    _const_spec((1, D), lambda i: (0, 0)),       # gamma (resident)
                    _const_spec((1, D), lambda i: (0, 0)),       # beta  (resident)
                    _const_spec((D, H), lambda i: (0, 0)),       # W1    (resident)
                    _const_spec((1, H), lambda i: (0, 0)),       # b1    (resident)
                    _const_spec((H, D), lambda i: (0, 0)),       # W2    (resident)
                    _const_spec((1, D), lambda i: (0, 0)),       # b2    (resident)
                ],
                out_specs=pl.BlockSpec((TM, D), lambda i: (i, 0)),
            ),
            compiler_params=pltpu.CompilerParams(
                dimension_semantics=("parallel",),
                vmem_limit_bytes=vmem_limit),
            cost_estimate=cost,
        )(x2d, g2, be2, w1_bf, b1_2, w2_bf, b2_2)
    else:
        n_h_tiles = H // TH
        cost = pl.CostEstimate(
            flops=flops, transcendentals=transcendentals,
            bytes_accessed=(padded_rows * D * (x_bytes + 4)
                            + n_row_tiles * (D * H + H * D) * 2   # weights re-streamed per row tile
                            + (H + 3 * D) * 4))
        out2d = pl.pallas_call(
            _ffn_split_kernel,
            out_shape=jax.ShapeDtypeStruct((padded_rows, D), jnp.float32),
            grid_spec=pltpu.PrefetchScalarGridSpec(
                num_scalar_prefetch=0,
                grid=(n_row_tiles, n_h_tiles),
                in_specs=[
                    pl.BlockSpec((TM, D), lambda i, k: (i, 0)),   # x row tile
                    _const_spec((1, D), lambda i, k: (0, 0)),     # gamma
                    _const_spec((1, D), lambda i, k: (0, 0)),     # beta
                    pl.BlockSpec((D, TH), lambda i, k: (0, k)),   # W1 column block
                    pl.BlockSpec((1, TH), lambda i, k: (0, k)),   # b1 block
                    pl.BlockSpec((TH, D), lambda i, k: (k, 0)),   # W2 row block
                    _const_spec((1, D), lambda i, k: (0, 0)),     # b2
                ],
                out_specs=pl.BlockSpec((TM, D), lambda i, k: (i, 0)),
                scratch_shapes=[pltpu.VMEM((TM, D), jnp.bfloat16)],  # cached LN output
            ),
            compiler_params=pltpu.CompilerParams(
                dimension_semantics=("parallel", "arbitrary"),
                vmem_limit_bytes=vmem_limit),
            cost_estimate=cost,
        )(x2d, g2, be2, w1_bf, b1_2, w2_bf, b2_2)
        if out2d.dtype != x.dtype:
            out2d = out2d.astype(x.dtype)

    if padded_rows != rows:
        out2d = out2d[:rows]
    return out2d.reshape(B, N, D)


def _reference(x, gamma, beta, w1, b1, w2, b2):
    mean = jnp.mean(x, axis=-1, keepdims=True)
    var = jnp.mean((x - mean) ** 2, axis=-1, keepdims=True)
    y = (x - mean) / jnp.sqrt(var + LN_EPS) * gamma + beta
    h = y @ w1 + b1
    h = jax.nn.gelu(h, approximate=False)
    return h @ w2 + b2


def _make_params(key, D, H):
    kw1, kb1, kw2, kb2 = jax.random.split(key, 4)
    gamma = jnp.ones((D,), jnp.float32)
    beta = jnp.zeros((D,), jnp.float32)
    w1 = jax.random.normal(kw1, (D, H), jnp.float32) * (1.0 / math.sqrt(D))
    b1 = jax.random.normal(kb1, (H,), jnp.float32) * 0.01
    w2 = jax.random.normal(kw2, (H, D), jnp.float32) * (1.0 / math.sqrt(H))
    b2 = jax.random.normal(kb2, (D,), jnp.float32) * 0.01
    return gamma, beta, w1, b1, w2, b2


if __name__ == "__main__":
    key = jax.random.PRNGKey(0)

    # --- Case 1: resident-weight path (small ViT shapes, row padding, 2 tiles) ---
    B, N, D, H = 2, 13, 32, 64
    kx, kp = jax.random.split(key)
    x = jax.random.normal(kx, (B, N, D), dtype=jnp.float32)
    gamma, beta, w1, b1, w2, b2 = _make_params(kp, D, H)
    # Cache bf16 weights once (model init), not per call.
    w1_bf, w2_bf = w1.astype(jnp.bfloat16), w2.astype(jnp.bfloat16)

    out = feed_forward(x, gamma, beta, w1_bf, b1, w2_bf, b2)
    out = jax.block_until_ready(out)
    ref = _reference(x, gamma, beta, w1, b1, w2, b2)
    assert out.shape == (B, N, D)
    # bf16 MXU inputs (f32 accumulation) -> loosened tolerance vs f32 reference.
    assert jnp.allclose(out, ref, atol=7e-2, rtol=7e-2), (
        "case1 mismatch; max abs diff = "
        f"{float(jnp.max(jnp.abs(out - ref)))}")

    # --- Case 2: hidden-split fallback path (forced), multi row & hidden tiles ---
    B2, N2, D2, H2 = 2, 16, 64, 256
    kx2, kp2 = jax.random.split(kp)
    x2 = jax.random.normal(kx2, (B2, N2, D2), dtype=jnp.float32)
    params2 = _make_params(kp2, D2, H2)

    out2 = feed_forward(x2, *params2, tm=16, th=128, force_split=True)  # 2 row x 2 hidden tiles
    out2 = jax.block_until_ready(out2)
    ref2 = _reference(x2, *params2)
    assert out2.shape == (B2, N2, D2)
    assert jnp.allclose(out2, ref2, atol=7e-2, rtol=7e-2), (
        "case2 mismatch; max abs diff = "
        f"{float(jnp.max(jnp.abs(out2 - ref2)))}")

    print("KERNEL_OK")
</pallas_src>

<mosaic_0001>
module attributes {stable_mosaic.version = 11 : i64} {
  func.func @_ffn_resident_kernel(%arg0: i32, %arg1: memref<16x32xf32, #tpu.memory_space<vmem>>, %arg2: memref<1x32xf32, #tpu.memory_space<vmem>>, %arg3: memref<1x32xf32, #tpu.memory_space<vmem>>, %arg4: memref<32x64xbf16, #tpu.memory_space<vmem>>, %arg5: memref<1x64xf32, #tpu.memory_space<vmem>>, %arg6: memref<64x32xbf16, #tpu.memory_space<vmem>>, %arg7: memref<1x32xf32, #tpu.memory_space<vmem>>, %arg8: memref<16x32xf32, #tpu.memory_space<vmem>>) attributes {dimension_semantics = [#tpu.dimension_semantics<parallel>], iteration_bounds = array<i64: 2>, scalar_prefetch = 0 : i64, scratch_operands = 0 : i64, tpu.core_type = #tpu.core_type<tc>, window_params = [{transform_indices = @transform_0, window_bounds = array<i64: 16, 32>}, {pipeline_mode = #tpu.pipeline_mode<synchronous>, transform_indices = @transform_1, window_bounds = array<i64: 1, 32>}, {pipeline_mode = #tpu.pipeline_mode<synchronous>, transform_indices = @transform_2, window_bounds = array<i64: 1, 32>}, {pipeline_mode = #tpu.pipeline_mode<synchronous>, transform_indices = @transform_3, window_bounds = array<i64: 32, 64>}, {pipeline_mode = #tpu.pipeline_mode<synchronous>, transform_indices = @transform_4, window_bounds = array<i64: 1, 64>}, {pipeline_mode = #tpu.pipeline_mode<synchronous>, transform_indices = @transform_5, window_bounds = array<i64: 64, 32>}, {pipeline_mode = #tpu.pipeline_mode<synchronous>, transform_indices = @transform_6, window_bounds = array<i64: 1, 32>}, {transform_indices = @transform_7, window_bounds = array<i64: 16, 32>}]} {
    %c0 = arith.constant 0 : index
    %c0_0 = arith.constant 0 : index
    %0 = vector.load %arg1[%c0, %c0_0] : memref<16x32xf32, #tpu.memory_space<vmem>>, vector<16x32xf32>
    %cst = arith.constant dense<0.000000e+00> : vector<16xf32>
    %1 = vector.multi_reduction <add>, %0, %cst [1] : vector<16x32xf32> to vector<16xf32>
    %2 = vector.shape_cast %1 : vector<16xf32> to vector<16x1xf32>
    %cst_1 = arith.constant 3.200000e+01 : f32
    %3 = vector.broadcast %cst_1 : f32 to vector<16x1xf32>
    %4 = arith.divf %2, %3 : vector<16x1xf32>
    %5 = vector.broadcast %4 : vector<16x1xf32> to vector<16x32xf32>
    %6 = arith.subf %0, %5 : vector<16x32xf32>
    %7 = arith.mulf %6, %6 : vector<16x32xf32>
    %cst_2 = arith.constant dense<0.000000e+00> : vector<16xf32>
    %8 = vector.multi_reduction <add>, %7, %cst_2 [1] : vector<16x32xf32> to vector<16xf32>
    %9 = vector.shape_cast %8 : vector<16xf32> to vector<16x1xf32>
    %cst_3 = arith.constant 3.200000e+01 : f32
    %10 = vector.broadcast %cst_3 : f32 to vector<16x1xf32>
    %11 = arith.divf %9, %10 : vector<16x1xf32>
    %cst_4 = arith.constant 9.99999974E-6 : f32
    %12 = vector.broadcast %cst_4 : f32 to vector<16x1xf32>
    %13 = arith.addf %11, %12 : vector<16x1xf32>
    %14 = math.rsqrt %13 : vector<16x1xf32>
    %15 = vector.broadcast %14 : vector<16x1xf32> to vector<16x32xf32>
    %16 = arith.mulf %6, %15 : vector<16x32xf32>
    %c0_5 = arith.constant 0 : index
    %c0_6 = arith.constant 0 : index
    %17 = vector.load %arg2[%c0_5, %c0_6] : memref<1x32xf32, #tpu.memory_space<vmem>>, vector<1x32xf32>
    %18 = vector.broadcast %17 : vector<1x32xf32> to vector<16x32xf32>
    %19 = arith.mulf %16, %18 : vector<16x32xf32>
    %c0_7 = arith.constant 0 : index
    %c0_8 = arith.constant 0 : index
    %20 = vector.load %arg3[%c0_7, %c0_8] : memref<1x32xf32, #tpu.memory_space<vmem>>, vector<1x32xf32>
    %21 = vector.broadcast %20 : vector<1x32xf32> to vector<16x32xf32>
    %22 = arith.addf %19, %21 : vector<16x32xf32>
    %23 = arith.truncf %22 : vector<16x32xf32> to vector<16x32xbf16>
    %c0_9 = arith.constant 0 : index
    %c0_10 = arith.constant 0 : index
    %24 = vector.load %arg4[%c0_9, %c0_10] : memref<32x64xbf16, #tpu.memory_space<vmem>>, vector<32x64xbf16>
    %cst_11 = arith.constant dense<0.000000e+00> : vector<16x64xf32>
    %25 = tpu.matmul %23, %24, %cst_11 {dimension_numbers = #tpu.dot_dimension_numbers<[1], [0], [0], [1], [0, 0, 1, 1], [], []>} : vector<16x32xbf16>, vector<32x64xbf16>, vector<16x64xf32> -> vector<16x64xf32>
    %c0_12 = arith.constant 0 : index
    %c0_13 = arith.constant 0 : index
    %26 = vector.load %arg5[%c0_12, %c0_13] : memref<1x64xf32, #tpu.memory_space<vmem>>, vector<1x64xf32>
    %27 = vector.broadcast %26 : vector<1x64xf32> to vector<16x64xf32>
    %28 = arith.addf %25, %27 : vector<16x64xf32>
    %cst_14 = arith.constant 5.000000e-01 : f32
    %29 = vector.broadcast %cst_14 : f32 to vector<16x64xf32>
    %30 = arith.mulf %29, %28 : vector<16x64xf32>
    %cst_15 = arith.constant 0.707106769 : f32
    %31 = vector.broadcast %cst_15 : f32 to vector<16x64xf32>
    %32 = arith.mulf %28, %31 : vector<16x64xf32>
    %33 = math.erf %32 : vector<16x64xf32>
    %cst_16 = arith.constant 1.000000e+00 : f32
    %34 = vector.broadcast %cst_16 : f32 to vector<16x64xf32>
    %35 = arith.addf %34, %33 : vector<16x64xf32>
    %36 = arith.mulf %30, %35 : vector<16x64xf32>
    %37 = arith.truncf %36 : vector<16x64xf32> to vector<16x64xbf16>
    %c0_17 = arith.constant 0 : index
    %c0_18 = arith.constant 0 : index
    %38 = vector.load %arg6[%c0_17, %c0_18] : memref<64x32xbf16, #tpu.memory_space<vmem>>, vector<64x32xbf16>
    %cst_19 = arith.constant dense<0.000000e+00> : vector<16x32xf32>
    %39 = tpu.matmul %37, %38, %cst_19 {dimension_numbers = #tpu.dot_dimension_numbers<[1], [0], [0], [1], [0, 0, 1, 1], [], []>} : vector<16x64xbf16>, vector<64x32xbf16>, vector<16x32xf32> -> vector<16x32xf32>
    %c0_20 = arith.constant 0 : index
    %c0_21 = arith.constant 0 : index
    %40 = vector.load %arg7[%c0_20, %c0_21] : memref<1x32xf32, #tpu.memory_space<vmem>>, vector<1x32xf32>
    %41 = vector.broadcast %40 : vector<1x32xf32> to vector<16x32xf32>
    %42 = arith.addf %39, %41 : vector<16x32xf32>
    %c0_22 = arith.constant 0 : index
    %c0_23 = arith.constant 0 : index
    %43 = vector.load %arg8[%c0_22, %c0_23] : memref<16x32xf32, #tpu.memory_space<vmem>>, vector<16x32xf32>
    tpu.vector_store %arg8[%c0_22, %c0_23], %42 {strides = array<i32>} : memref<16x32xf32, #tpu.memory_space<vmem>>, vector<16x32xf32>,
    return
  }
  func.func @transform_0(%arg0: i32) -> (i32, i32) {
    %c0_i32 = arith.constant 0 : i32
    %c0_i32_0 = arith.constant 0 : i32
    return %arg0, %c0_i32 : i32, i32
  }
  func.func @transform_1(%arg0: i32) -> (i32, i32) {
    %c0_i32 = arith.constant 0 : i32
    %c0_i32_0 = arith.constant 0 : i32
    %c0_i32_1 = arith.constant 0 : i32
    return %c0_i32, %c0_i32_0 : i32, i32
  }
  func.func @transform_2(%arg0: i32) -> (i32, i32) {
    %c0_i32 = arith.constant 0 : i32
    %c0_i32_0 = arith.constant 0 : i32
    %c0_i32_1 = arith.constant 0 : i32
    return %c0_i32, %c0_i32_0 : i32, i32
  }
  func.func @transform_3(%arg0: i32) -> (i32, i32) {
    %c0_i32 = arith.constant 0 : i32
    %c0_i32_0 = arith.constant 0 : i32
    %c0_i32_1 = arith.constant 0 : i32
    return %c0_i32, %c0_i32_0 : i32, i32
  }
  func.func @transform_4(%arg0: i32) -> (i32, i32) {
    %c0_i32 = arith.constant 0 : i32
    %c0_i32_0 = arith.constant 0 : i32
    %c0_i32_1 = arith.constant 0 : i32
    return %c0_i32, %c0_i32_0 : i32, i32
  }
  func.func @transform_5(%arg0: i32) -> (i32, i32) {
    %c0_i32 = arith.constant 0 : i32
    %c0_i32_0 = arith.constant 0 : i32
    %c0_i32_1 = arith.constant 0 : i32
    return %c0_i32, %c0_i32_0 : i32, i32
  }
  func.func @transform_6(%arg0: i32) -> (i32, i32) {
    %c0_i32 = arith.constant 0 : i32
    %c0_i32_0 = arith.constant 0 : i32
    %c0_i32_1 = arith.constant 0 : i32
    return %c0_i32, %c0_i32_0 : i32, i32
  }
  func.func @transform_7(%arg0: i32) -> (i32, i32) {
    %c0_i32 = arith.constant 0 : i32
    %c0_i32_0 = arith.constant 0 : i32
    return %arg0, %c0_i32 : i32, i32
  }
}

</mosaic_0001>

<bundles_post_ra>
// kernel: tpu_custom_call.1
= control target key start
LH: loop header
LB: loop body
LE: loop exit
PB: predicated region body
PF: predicated region fallthrough
CT: control target
= control target key end

     0   :  { %12 = vsyncpa [#allocation3], 0  ;;  %s1033_s0 = inlined_call_operand.vmem [shape: f32[32,32], index: 0, kind: input, shape index: {}]   ;;  %s1034_s1 = inlined_call_operand.hbm [shape: f32[1,32], index: 1, kind: input, shape index: {}]   ;;  %s1035_s2 = inlined_call_operand.vmem [shape: f32[1,32], index: 2, kind: input, shape index: {}]   ;;  %s1036_s3 = inlined_call_operand.vmem [shape: bf16[32,64], index: 3, kind: input, shape index: {}]   ;;  %s1037_s4 = inlined_call_operand.vmem [shape: f32[1,64], index: 4, kind: input, shape index: {}]   ;;  %s1038_s5 = inlined_call_operand.vmem [shape: bf16[64,32], index: 5, kind: input, shape index: {}]   ;;  %s1039_s6 = inlined_call_operand.vmem [shape: f32[1,32], index: 6, kind: input, shape index: {}]   ;;  %s1040_s7 = inlined_call_operand.hbm [shape: f32[32,32], index: 7, kind: output, shape index: {}]  }
   0x1   :  { %13 = vsyncpa [#allocation4], 0 }
   0x2   :  { %15 = vsyncpa [#allocation4 + $0x1], 0  ;;  %s893_s24 = smov 0   ;;  %s895_s25 = smov 0  }
   0x3   :  { %s897_s26 = smov 0   ;;  %s899_s27 = smov 0  }
   0x4 LB: > { %s914_s28 = sadd.s32 4294967295, %s847_s27   ;;  %s635_s29 = sadd.s32 4294967294, %s847_s27   ;;  %s847_s27 = sphi %s899_s27, %s1046_s27   ;;  %s843_s26 = sphi %s897_s26, %s1045_s26   ;;  %s839_s25 = sphi %s895_s25, %s1044_s25   ;;  %s835_s24 = sphi %s893_s24, %s1043_s24  }
   0x5   : > { %s918_s30 = sadd.s32 1, %s847_s27   ;;  %s180_s8 = sadd.s32 1, %s843_s26 }
   0x6   : > { %s177_s9 = ssub.s32 %s847_s27, %s918_s30  ;;  %p190_p0 = scmp.ne.s32.totalorder %s843_s26, %s839_s25 }
   0x7   : > { %p178_p1 = scmp.eq.s32.totalorder %s177_s9, 0  ;;  %p191_p2 = scmp.eq.s32.totalorder %s914_s28, 1 }
   0x8   : > { %p196_p3 = scmp.ne.s32.totalorder %s839_s25, %s835_s24  ;;  %p197_p4 = scmp.eq.s32.totalorder %s635_s29, 1 }
   0x9   : > { %s929_s10 = scalar_select %p178_p1, %s843_s26, %s180_s8  }
   0xa   : > { %p931_p5 = por %p191_p2, %p190_p0  ;;  %p935_p6 = por %p197_p4, %p196_p3 }
   0xb   : > { %p636_p7 = scmp.ge.s32.totalorder %s847_s27, 1  ;;  %p204_p8 = scmp.lt.s32.totalorder %s847_s27, 3 }
   0xc   : > { %p698_p9 = scmp.eq.s32.totalorder %s914_s28, 0  ;;  %s216_s15 = sshll.u32 %s1034_s1, 4  ;;  %s217_s15 = int_to_ptr.hbm [resolvable:$true] %s216_s15 }
   0xd   : > { %p205_p10 = pnand %p636_p7, %p204_p8  ;;  %s849_s16 = smov [#allocation2]  }
   0xe   : > { %s218_s17 = sshll.u32 %s849_s16, 4  ;;  %s219_s17 = int_to_ptr.vmem [resolvable:$true] %s218_s17 }
   0xf   : > { %p690_p11 = pneg %p205_p10  ;;  %255 = sbr.rel (%p205_p10) target bundleno = 635 (0x27b), region = 48 }
  0x11   : > { %p691_p12 = pnand %p698_p9, %p690_p11 }
  0x13   : > { %693 = dma.hbm_to_vmem [thread:$0]  (!%p691_p12), %s217_s15, 16, %s219_s17, [#allocation3]  }
  0x14   : > { %826 = dma.done.wait (%p698_p9), [#allocation3], 16  }
  0x15   : > { %828 = vsyncadd (%p698_p9), [#allocation3], 4294967280  ;;  %s642_s18 = sshll.u32 %s914_s28, 1  ;;  %vm298_vm0 = vcmask 261120   ;;  %v850_v4 = vmov 32.0   ;;  %v678_v21 = vld [vmem:[%s1036_s3 + $0x8] sm:$0xff] }
  0x16   : > { %p289_p13 = scmp.lt.s32.totalorder %s642_s18, 3  ;;  %741 = vrcp.f32 %v850_v4  ;;  %392 = vmatpush.bf16.msra.mxu0 %v678_v21  ;;  %v677_v23 = vld [vmem:[%s1036_s3] sm:$0xff]  ;;  %s285_s8 = sand.u32 1, %s839_s25  }
  0x17   : > { %v737_v42 = vld [vmem:[#allocation2] ss:$0 sm:$0xff]  ;;  %s641_s9 = sshll.u32 %s285_s8, 4  ;;  %s683_s15 = sshll.u32 %s914_s28, 4 }
  0x18   : > { %s1048_s18 = smov (!%p289_p13, %s642_s18), 3  ;;  %v738_v47 = vld [vmem:[%s1035_s2] ss:$0 sm:$0xff]  ;;  %s287_s16 = scalar_lea.vmem [#allocation5], %s641_s9 }
  0x19   : > { %s643_s19 = sshll.u32 %s1048_s18, 3  ;;  %v739_v52 = vld [vmem:[%s1037_s4] ss:$0 sm:$0xff]  ;;  %s558_s20 = sshll.u32 %s287_s16, 4  ;;  %s559_s20 = int_to_ptr.vmem [resolvable:$true] %s558_s20 }
  0x1a   : > { %s292_s22 = scalar_lea.vmem %s1033_s0, %s643_s19  ;;  %393 = vmatpush.bf16.msra.mxu0 %v677_v23  ;;  %v680_v23 = vld [vmem:[%s1038_s5 + $0x8] sm:$0xff]  ;;  %s557_s19 = scalar_lea.hbm %s1040_s7, %s683_s15 }
  0x1b   : > { %v296_v0 = vld [vmem:[%s292_s22] sm:$0xff]  ;;  %v297_v2 = vld [vmem:[%s292_s22 + $0x8] sm:$0xff]  ;;  %s560_s21 = sshll.u32 %s557_s19, 4  ;;  %s546_s22 = scalar_lea.sflag [#allocation4], %s285_s8  ;;  %s561_s21 = int_to_ptr.hbm [resolvable:$true] %s560_s21 }
  0x1c   : > { %v299_v1 = vsel %vm298_vm0, %v296_v0, 0.0  ;;  %v302_v3 = vsel %vm298_vm0, %v297_v2, 0.0  ;;  %v742_v5 = vpop.eup %741  ;;  %s795_s23 = sshra.s32 %s561_s21, 4  ;;  %s801_s13 = scalar_lea.hbm %s1040_s7, 32  ;;  %s796_s23 = int_to_ptr.hbm [resolvable:$true] %s795_s23 }
  0x1d   : > { %300 = vadd.xlane.f32.xlu0 %v299_v1  ;;  %v306_v6 = vmul.f32 32.0, %v742_v5  ;;  %vm310_vm1 = vweird.f32 %v742_v5  ;;  %s797_s28 = scalar_lea.hbm %s796_s23, 16  ;;  %p802_p3 = scmp.lt.s32.totalorder %s796_s23, %s1040_s7 }
  0x1e   : > { %p798_p0 = scmp.ne.s32.totalorder %s796_s23, %s797_s28  ;;  %p803_p4 = scmp.lt.s32.totalorder %s801_s13, %s797_s28 }
  0x1f   : > { %v307_v7 = vsub.f32 1.0, %v306_v6 }
  0x20   : > { %p799_p1 = pnand %p798_p0, %p931_p5  ;;  %p804_p7 = por %p803_p4, %p802_p3 }
  0x21   : > { %v308_v8 = vmul.f32 %v742_v5, %v307_v7  ;;  %v682_v7 = vld [vmem:[%s1038_s5 + $0x18] sm:$0xff] }
  0x22   : > { %533 = vmatpush.bf16.msra.mxu1 %v682_v7  ;;  %p800_p2 = pneg %p799_p1 }
  0x23   : > { %v309_v9 = vadd.f32 %v742_v5, %v308_v8 }
  0x24   : > { %p805_p8 = pnand %p804_p7, %p800_p2 }
  0x25   : > { %303 = vadd.xlane.f32.xlu0 %v302_v3  ;;  %v311_v10 = vsel %vm310_vm1, %v742_v5, %v309_v9  ;;  %vm525_vm1 = vcmask 523264  }
  0x90   : > { %v301_v11 = vpop.xlane.xlu0 %300 }
  0x91   : > { %v312_v12 = vmul.f32 %v311_v10, %v301_v11 }
  0x93   : > { %v314_v13 = vsub.f32 %v296_v0, %v312_v12 }
  0x95   : > { %v316_v14 = vmul.f32 %v314_v13, %v314_v13 }
  0x97   : > { %v318_v15 = vsel %vm298_vm0, %v316_v14, 0.0 }
  0x98   : > { %319 = vadd.xlane.f32.xlu1 %v318_v15  ;;  %v304_v16 = vpop.xlane.xlu0 %303  ;;  %v681_v15 = vld [vmem:[%s1038_s5 + $0x10] sm:$0xff] }
  0x99   : > { %v313_v17 = vmul.f32 %v311_v10, %v304_v16  ;;  %534 = vmatpush.bf16.msra.mxu1 %v681_v15 }
  0x9b   : > { %v315_v18 = vsub.f32 %v297_v2, %v313_v17 }
  0x9d   : > { %v317_v19 = vmul.f32 %v315_v18, %v315_v18  ;;  %535 = vmatpush.bf16.msra.mxu1 %v680_v23 }
  0x9f   : > { %v321_v20 = vsel %vm298_vm0, %v317_v19, 0.0 }
  0xa0   : > { %322 = vadd.xlane.f32.xlu1 %v321_v20 }
 0x10b   : > { %v320_v22 = vpop.xlane.xlu1 %319 }
 0x10c   : > { %v324_v24 = vmul.f32 %v320_v22, %v311_v10 }
 0x10e   : > { %v326_v25 = vadd.f32 1e-05, %v324_v24 }
 0x110   : > { %743 = vrsqrt.f32 %v326_v25  ;;  %vm334_vm3 = vweird.f32 %v326_v25 }
 0x113   : > { %v323_v26 = vpop.xlane.xlu1 %322 }
 0x114   : > { %v325_v27 = vmul.f32 %v323_v26, %v311_v10 }
 0x116   : > { %v744_v28 = vpop.eup %743  ;;  %v327_v29 = vadd.f32 1e-05, %v325_v27 }
 0x117   : > { %v329_v30 = vmul.f32 %v744_v28, %v326_v25  ;;  %vm335_vm2 = vweird.f32 %v744_v28 }
 0x118   : > { %745 = vrsqrt.f32 %v327_v29  ;;  %vm336_vm4 = vmor %vm334_vm3, %vm335_vm2  ;;  %vm344_vm6 = vweird.f32 %v327_v29 }
 0x119   : > { %v330_v31 = vmul.f32 %v744_v28, %v329_v30 }
 0x11b   : > { %v331_v32 = vmul.f32 0.5, %v330_v31 }
 0x11d   : > { %v332_v33 = vsub.f32 1.5, %v331_v32 }
 0x11e   : > { %v746_v34 = vpop.eup %745 }
 0x11f   : > { %v333_v35 = vmul.f32 %v744_v28, %v332_v33  ;;  %v339_v36 = vmul.f32 %v746_v34, %v327_v29  ;;  %vm345_vm5 = vweird.f32 %v746_v34  ;;  %v679_v29 = vld [vmem:[%s1038_s5] sm:$0xff] }
 0x120   : > { %vm346_vm7 = vmor %vm344_vm6, %vm345_vm5  ;;  %536 = vmatpush.bf16.msra.mxu1 %v679_v29 }
 0x121   : > { %v340_v37 = vmul.f32 %v746_v34, %v339_v36  ;;  %v337_v38 = vsel %vm336_vm4, %v744_v28, %v333_v35 }
 0x122   : > { %v348_v41 = vmul.f32 %v337_v38, %v314_v13 }
 0x123   : > { %v341_v39 = vmul.f32 0.5, %v340_v37 }
 0x124   : > { %v354_v46 = vmul.f32 %v737_v42, %v348_v41 }
 0x125   : > { %v342_v40 = vsub.f32 1.5, %v341_v39 }
 0x126   : > { %v360_v49 = vadd.f32 %v738_v47, %v354_v46 }
 0x127   : > { %v343_v43 = vmul.f32 %v746_v34, %v342_v40 }
 0x129   : > { %v347_v44 = vsel %vm346_vm7, %v746_v34, %v343_v43 }
 0x12a   : > { %v349_v45 = vmul.f32 %v347_v44, %v315_v18 }
 0x12c   : > { %v355_v48 = vmul.f32 %v737_v42, %v349_v45 }
 0x12e   : > { %v361_v50 = vadd.f32 %v738_v47, %v355_v48 }
 0x130   : > { %v362_v51 = vpack.c.bf16 %v361_v50, %v360_v49 }
 0x132   : > { %652 = vmatmul.msk.bf16.vlgmr.msra.gmra.mxu0 %vm298_vm0, %v362_v51 }
 0x1af   : > { %v395_v53 = vpop.f32.mrf.mxu0 }
 0x1b0   : > { %v966_v54 = vadd.f32 %v739_v52, %v395_v53 }
 0x1b2   : > { %v969_v55 = vmul.f32 0.70710677, %v966_v54 }
 0x1b4   : > { %v404_v56 = vmul.f32 %v969_v55, %v969_v55 }
 0x1b6   : > { %v405_v57 = vmin.f32 %v404_v56, 16.0 }
 0x1b7   : > { %v397_v58 = vpop.f32.mrf.mxu0 }
 0x1b8   : > { %v406_v59 = vmul.f32 2.1237322e-06, %v405_v57  ;;  %v417_v60 = vmul.f32 3.8918573e-05, %v405_v57  ;;  %v973_v61 = vadd.f32 %v739_v52, %v397_v58 }
 0x1ba   : > { %v407_v62 = vadd.f32 0.00028619796, %v406_v59  ;;  %v418_v63 = vadd.f32 0.001143296, %v417_v60  ;;  %v976_v0 = vmul.f32 0.70710677, %v973_v61 }
 0x1bc   : > { %v419_v1 = vmul.f32 %v418_v63, %v405_v57  ;;  %v444_v2 = vmul.f32 %v976_v0, %v976_v0  ;;  %v408_v3 = vmul.f32 %v407_v62, %v405_v57 }
 0x1be   : > { %v420_v4 = vadd.f32 0.014752088, %v419_v1  ;;  %v445_v5 = vmin.f32 %v444_v2, 16.0  ;;  %v409_v10 = vadd.f32 0.0036580483, %v408_v3 }
 0x1c0   : > { %v421_v6 = vmul.f32 %v420_v4, %v405_v57  ;;  %v446_v8 = vmul.f32 2.1237322e-06, %v445_v5  ;;  %v457_v9 = vmul.f32 3.8918573e-05, %v445_v5  ;;  %v410_v18 = vmul.f32 %v409_v10, %v405_v57 }
 0x1c1   : > { %v401_v10 = vmul.f32 0.5, %v973_v61 }
 0x1c2   : > { %v422_v11 = vadd.f32 0.112945676, %v421_v6  ;;  %v447_v12 = vadd.f32 0.00028619796, %v446_v8  ;;  %v458_v13 = vadd.f32 0.001143296, %v457_v9 }
 0x1c3   : > { %v411_v25 = vadd.f32 0.05243302, %v410_v18  ;;  %v400_v9 = vmul.f32 0.5, %v966_v54 }
 0x1c4   : > { %v423_v14 = vmul.f32 %v422_v11, %v405_v57  ;;  %v448_v16 = vmul.f32 %v447_v12, %v445_v5  ;;  %v459_v17 = vmul.f32 %v458_v13, %v445_v5 }
 0x1c5   : > { %v412_v31 = vmul.f32 %v411_v25, %v405_v57 }
 0x1c6   : > { %v424_v19 = vadd.f32 0.4994258, %v423_v14  ;;  %v449_v20 = vadd.f32 0.0036580483, %v448_v16  ;;  %v460_v21 = vadd.f32 0.014752088, %v459_v17 }
 0x1c7   : > { %v413_v36 = vadd.f32 0.18741608, %v412_v31 }
 0x1c8   : > { %v425_v22 = vmul.f32 %v424_v19, %v405_v57  ;;  %v461_v24 = vmul.f32 %v460_v21, %v445_v5  ;;  %v450_v27 = vmul.f32 %v449_v20, %v445_v5 }
 0x1c9   : > { %v414_v41 = vmul.f32 %v413_v36, %v405_v57 }
 0x1ca   : > { %v426_v26 = vadd.f32 1.0, %v425_v22  ;;  %v462_v28 = vadd.f32 0.112945676, %v461_v24  ;;  %v451_v32 = vadd.f32 0.05243302, %v450_v27 }
 0x1cb   : > { %v415_v47 = vadd.f32 1.1283791, %v414_v41 }
 0x1cc   : > { %747 = vrcp.f32 %v426_v26  ;;  %v463_v30 = vmul.f32 %v462_v28, %v445_v5  ;;  %v452_v38 = vmul.f32 %v451_v32, %v445_v5  ;;  %v438_v43 = vand.u32 2147483648, %v426_v26 }
 0x1cd   : > { %v436_v45 = vand.u32 2147483647, %v426_v26  ;;  %vm432_vm9 = vweird.f32 %v426_v26  ;;  %v416_v56 = vmul.f32 %v415_v47, %v969_v55 }
 0x1ce   : > { %v464_v33 = vadd.f32 0.4994258, %v463_v30  ;;  %v453_v44 = vadd.f32 0.18741608, %v452_v38  ;;  %v439_v50 = vor.u32 1.1754944e-38, %v438_v43 }
 0x1cf   : > { %vm437_vm11 = vcmp.eq.f32.partialorder %v436_v45, 8.507059e+37 }
 0x1d0   : > { %v465_v34 = vmul.f32 %v464_v33, %v445_v5  ;;  %v454_v51 = vmul.f32 %v453_v44, %v445_v5 }
 0x1d2   : > { %v748_v35 = vpop.eup %747  ;;  %v466_v39 = vadd.f32 1.0, %v465_v34  ;;  %v455_v57 = vadd.f32 1.1283791, %v454_v51 }
 0x1d3   : > { %v428_v37 = vmul.f32 %v748_v35, %v426_v26  ;;  %vm433_vm8 = vweird.f32 %v748_v35 }
 0x1d4   : > { %749 = vrcp.f32 %v466_v39  ;;  %vm434_vm10 = vmor %vm432_vm9, %vm433_vm8  ;;  %v478_v59 = vand.u32 2147483648, %v466_v39  ;;  %v476_v63 = vand.u32 2147483647, %v466_v39  ;;  %vm472_vm13 = vweird.f32 %v466_v39 }
 0x1d5   : > { %v429_v40 = vsub.f32 1.0, %v428_v37  ;;  %v456_v4 = vmul.f32 %v455_v57, %v976_v0  ;;  %v740_v0 = vld [vmem:[%s1039_s6] ss:$0 sm:$0xff] }
 0x1d6   : > { %v479_v2 = vor.u32 1.1754944e-38, %v478_v59  ;;  %vm477_vm15 = vcmp.eq.f32.partialorder %v476_v63, 8.507059e+37 }
 0x1d7   : > { %v430_v42 = vmul.f32 %v748_v35, %v429_v40 }
 0x1d9   : > { %v431_v46 = vadd.f32 %v748_v35, %v430_v42 }
 0x1da   : > { %v750_v48 = vpop.eup %749 }
 0x1db   : > { %v435_v49 = vsel %vm434_vm10, %v748_v35, %v431_v46  ;;  %v468_v52 = vmul.f32 %v750_v48, %v466_v39  ;;  %vm473_vm12 = vweird.f32 %v750_v48 }
 0x1dc   : > { %v440_v53 = vsel %vm437_vm11, %v439_v50, %v435_v49  ;;  %vm474_vm14 = vmor %vm472_vm13, %vm473_vm12 }
 0x1dd   : > { %v469_v58 = vsub.f32 1.0, %v468_v52  ;;  %v441_v60 = vmul.f32 %v440_v53, %v416_v56 }
 0x1df   : > { %v470_v62 = vmul.f32 %v750_v48, %v469_v58  ;;  %v653_v3 = vclamps-f32 %v441_v60, 1.0 }
 0x1e1   : > { %v471_v1 = vadd.f32 %v750_v48, %v470_v62  ;;  %v484_v7 = vadd.f32 1.0, %v653_v3 }
 0x1e3   : > { %v475_v5 = vsel %vm474_vm14, %v750_v48, %v471_v1  ;;  %v486_v12 = vmul.f32 %v484_v7, %v400_v9 }
 0x1e4   : > { %v480_v6 = vsel %vm477_vm15, %v479_v2, %v475_v5 }
 0x1e5   : > { %v481_v55 = vmul.f32 %v480_v6, %v456_v4 }
 0x1e7   : > { %v654_v8 = vclamps-f32 %v481_v55, 1.0 }
 0x1e9   : > { %v485_v11 = vadd.f32 1.0, %v654_v8 }
 0x1eb   : > { %v487_v13 = vmul.f32 %v485_v11, %v401_v10 }
 0x1ed   : > { %v488_v14 = vpack.c.bf16 %v487_v13, %v486_v12 }
 0x1ef   : > { %671 = vmatmul.msk.bf16.vlgmr.msra.gmra.mxu1 %vm525_vm1, %v488_v14 }
 0x26c   : > { %v538_v15 = vpop.f32.mrf.mxu1 }
 0x26d   : > { %v539_v16 = vadd.f32 %v740_v0, %v538_v15 }
 0x26f   : > { %543 = vst.msk [vmem:[%s287_s16] sm:$0xff] %vm298_vm0, %v539_v16 }
 0x274   : > { %v540_v54 = vpop.f32.mrf.mxu1 }
 0x275   : > { %v541_v61 = vadd.f32 %v740_v0, %v540_v54 }
 0x277   : > { %544 = vst.msk [vmem:[%s287_s16 + $0x8] sm:$0xff] %vm298_vm0, %v541_v61 }
 0x278   : > { %808 = shalt.err (!%p805_p8)
}
 0x279   : > { %s851_s8 = smov 128   ;;  %s852_s16 = smov 8  }
 0x27a   : > { %688 = dma.vmem_to_hbm [thread:$0]  (%p931_p5), %s559_s20, 256, %s561_s21, %s546_s22, %s851_s8, %s851_s8, %s852_s16  }
 0x27b PF: > { %p700_p9 = scmp.ge.s32.totalorder %s847_s27, 2  ;;  %s575_s17 = sand.u32 1, %s835_s24  }
 0x27c   : > { %s576_s18 = scalar_lea.sflag [#allocation4], %s575_s17 }
 0x27d   : > { %p695_p10 = pnand %p700_p9, %p935_p6 }
 0x27f   : > { %p696_p11 = pneg %p695_p10 }
 0x281   : > { %830 = dma.done.wait (%p696_p11), %s576_s18, 256  }
 0x282   : > { %832 = vsyncadd (%p696_p11), %s576_s18, 4294967040  ;;  %p18_p12 = scmp.ge.s32.totalorder %s918_s30, 4   ;;  %s1043_s24 = smov %s839_s25 }
 0x283   : > { %s1044_s25 = smov %s843_s26  ;;  %s1045_s26 = smov %s929_s10 }
 0x284   : > { %s1046_s27 = smov %s918_s30  ;;  %20 = sbr.rel (!%p18_p12) target bundleno = 4 (0x4), region = 88 }
 0x289   :  { %582 = vsyncpa [#allocation3], 1 }
 0x28a   :  { %584 = vsyncpa [#allocation3 + $0x1], 1 }
 0x28b   :  { %585 = vsyncpa [#allocation4], 1 }
 0x28c   :  { %587 = vsyncpa [#allocation4 + $0x1], 1 }

</bundles_post_ra>
